<compile_context>
chip_gen: v7x
topology: tpu7x:2x2x1
jax: 0.10.0
libtpu: 0.0.40
codegen_flags: <defaults>
</compile_context>

<pallas_src>
import functools

import jax
import jax.numpy as jnp
from jax.experimental import pallas as pl
from jax.experimental.pallas import tpu as pltpu


def _normalize_pad(pad):
    if isinstance(pad, int):
        return pad, pad, pad, pad
    assert isinstance(pad, (tuple, list)) and len(pad) == 4, (
        f'tuple pad should have format (pad_left, pad_right, pad_top, pad_bottom), but got {pad}')
    return tuple(pad)


def _round_up(x, m):
    return (x + m - 1) // m * m


def _pick_tile_c(c, h, w, h_out, w_out, itemsize, budget_bytes):
    """Largest divisor of C whose double-buffered in+out blocks fit the VMEM budget."""
    word = max(itemsize, 4)  # conservative (8,128)-tile-padded estimate

    def block_bytes(tc):
        in_b = tc * _round_up(h, 8) * _round_up(w, 128) * word
        out_b = tc * _round_up(h_out, 8) * _round_up(w_out, 128) * word
        return 2 * (in_b + out_b)          # double buffering on input and output

    for tc in range(c, 0, -1):
        if c % tc == 0 and block_bytes(tc) <= budget_bytes:
            return tc
    return 1


def _symmetric_pad_kernel(x_ref, o_ref, *, h, w, pad_l, pad_r, pad_t, pad_b):
    # x_ref: (1, TC, H, W)   o_ref: (1, TC, H_out, W_out)
    x = x_ref[...]

    # Interior: each output element is written exactly once (no zero-fill pass).
    o_ref[:, :, pad_t:pad_t + h, pad_l:pad_l + w] = x

    # Left / right bands (interior rows): edge-inclusive mirror along W.
    for i in range(pad_l):
        o_ref[:, :, pad_t:pad_t + h, i:i + 1] = x[:, :, :, pad_l - 1 - i:pad_l - i]
    for i in range(pad_r):
        o_ref[:, :, pad_t:pad_t + h, pad_l + w + i:pad_l + w + i + 1] = (
            x[:, :, :, w - 1 - i:w - i])

    # Top / bottom bands: full-width copies of already-completed interior rows
    # (read back from the output block while it is resident in VMEM), so the
    # corners come along for free.
    for j in range(pad_t):
        o_ref[:, :, j:j + 1, :] = o_ref[:, :, 2 * pad_t - 1 - j:2 * pad_t - j, :]
    for j in range(pad_b):
        o_ref[:, :, pad_t + h + j:pad_t + h + j + 1, :] = (
            o_ref[:, :, pad_t + h - 1 - j:pad_t + h - j, :])


def symmetric_pad2d_pallas(x, pad):
    assert x.ndim == 4, f'Only support 4D tensor input, but got {x.shape}'
    pad_l, pad_r, pad_t, pad_b = _normalize_pad(pad)
    n, c, h, w = x.shape
    assert 0 <= pad_t <= h and 0 <= pad_b <= h, (pad_t, pad_b, h)
    assert 0 <= pad_l <= w and 0 <= pad_r <= w, (pad_l, pad_r, w)

    h_out = h + pad_t + pad_b
    w_out = w + pad_l + pad_r
    itemsize = jnp.dtype(x.dtype).itemsize

    # Keep double-buffered blocks under ~24 MiB -> safe for v7x's 32 MiB scoped
    # default while letting v5e/v6e use the same tiling.
    budget_bytes = 24 * 1024 * 1024
    tile_c = _pick_tile_c(c, h, w, h_out, w_out, itemsize, budget_bytes)
    grid = (n, c // tile_c)

    kernel = functools.partial(
        _symmetric_pad_kernel, h=h, w=w,
        pad_l=pad_l, pad_r=pad_r, pad_t=pad_t, pad_b=pad_b)

    bytes_accessed = (n * c * h * w + n * c * h_out * w_out) * itemsize

    return pl.pallas_call(
        kernel,
        out_shape=jax.ShapeDtypeStruct((n, c, h_out, w_out), x.dtype),
        grid_spec=pl.GridSpec(
            grid=grid,
            in_specs=[pl.BlockSpec((1, tile_c, h, w), lambda i, j: (i, j, 0, 0))],
            out_specs=pl.BlockSpec((1, tile_c, h_out, w_out),
                                   lambda i, j: (i, j, 0, 0)),
        ),
        compiler_params=pltpu.CompilerParams(
            dimension_semantics=("parallel", "parallel"),
            vmem_limit_bytes=32 * 1024 * 1024,
        ),
        cost_estimate=pl.CostEstimate(
            flops=0, transcendentals=0, bytes_accessed=bytes_accessed),
    )(x)


def symmetric_pad2d_ref(x, pad):
    """Pure-JAX reference (matches the PyTorch SymmetricPad2d forward)."""
    pad_l, pad_r, pad_t, pad_b = _normalize_pad(pad)
    return jnp.pad(x, ((0, 0), (0, 0), (pad_t, pad_b), (pad_l, pad_r)),
                   mode='symmetric')


class SymmetricPad2d:
    """JAX/Pallas equivalent of the PyTorch SymmetricPad2d module.

    Args:
        pad (int or tuple): (pad_left, pad_right, pad_top, pad_bottom)
    """

    def __init__(self, pad):
        self.pad_l, self.pad_r, self.pad_t, self.pad_b = _normalize_pad(pad)

    def __call__(self, x):
        return symmetric_pad2d_pallas(
            x, (self.pad_l, self.pad_r, self.pad_t, self.pad_b))


if __name__ == "__main__":
    key = jax.random.PRNGKey(0)
    x = jax.random.normal(key, (2, 4, 16, 16), dtype=jnp.float32)

    # Symmetric integer padding.
    module = SymmetricPad2d(2)
    out = jax.block_until_ready(module(x))
    ref = symmetric_pad2d_ref(x, 2)
    assert out.shape == ref.shape, (out.shape, ref.shape)
    assert jnp.allclose(out, ref), "mismatch vs reference (int pad)"

    # Asymmetric tuple padding (includes a zero-width side).
    pad_tuple = (1, 2, 3, 0)
    module2 = SymmetricPad2d(pad_tuple)
    out2 = jax.block_until_ready(module2(x))
    ref2 = symmetric_pad2d_ref(x, pad_tuple)
    assert out2.shape == ref2.shape, (out2.shape, ref2.shape)
    assert jnp.allclose(out2, ref2), "mismatch vs reference (tuple pad)"

    print("KERNEL_OK")
</pallas_src>

<mosaic_0001>
module attributes {stable_mosaic.version = 11 : i64} {
  func.func @_symmetric_pad_kernel(%arg0: i32, %arg1: i32, %arg2: memref<1x4x16x16xf32, #tpu.memory_space<vmem>>, %arg3: memref<1x4x20x20xf32, #tpu.memory_space<vmem>>) attributes {dimension_semantics = [#tpu.dimension_semantics<parallel>, #tpu.dimension_semantics<parallel>], iteration_bounds = array<i64: 2, 1>, scalar_prefetch = 0 : i64, scratch_operands = 0 : i64, tpu.core_type = #tpu.core_type<tc>, window_params = [{transform_indices = @transform_0, window_bounds = array<i64: 1, 4, 16, 16>}, {transform_indices = @transform_1, window_bounds = array<i64: 1, 4, 20, 20>}]} {
    %c0 = arith.constant 0 : index
    %c0_0 = arith.constant 0 : index
    %c0_1 = arith.constant 0 : index
    %c0_2 = arith.constant 0 : index
    %0 = vector.load %arg2[%c0, %c0_0, %c0_1, %c0_2] : memref<1x4x16x16xf32, #tpu.memory_space<vmem>>, vector<1x4x16x16xf32>
    %c0_3 = arith.constant 0 : index
    %c0_4 = arith.constant 0 : index
    %c2 = arith.constant 2 : index
    %c2_5 = arith.constant 2 : index
    %1 = vector.load %arg3[%c0_3, %c0_4, %c2, %c2_5] : memref<1x4x20x20xf32, #tpu.memory_space<vmem>>, vector<1x4x16x16xf32>
    tpu.vector_store %arg3[%c0_3, %c0_4, %c2, %c2_5], %0 {strides = array<i32>} : memref<1x4x20x20xf32, #tpu.memory_space<vmem>>, vector<1x4x16x16xf32>,
    %2 = vector.extract_strided_slice %0 {offsets = [0, 0, 0, 1], sizes = [1, 4, 16, 1], strides = [1, 1, 1, 1]} : vector<1x4x16x16xf32> to vector<1x4x16x1xf32>
    %c0_6 = arith.constant 0 : index
    %c0_7 = arith.constant 0 : index
    %c2_8 = arith.constant 2 : index
    %c0_9 = arith.constant 0 : index
    %3 = vector.load %arg3[%c0_6, %c0_7, %c2_8, %c0_9] : memref<1x4x20x20xf32, #tpu.memory_space<vmem>>, vector<1x4x16x1xf32>
    tpu.vector_store %arg3[%c0_6, %c0_7, %c2_8, %c0_9], %2 {strides = array<i32>} : memref<1x4x20x20xf32, #tpu.memory_space<vmem>>, vector<1x4x16x1xf32>,
    %4 = vector.extract_strided_slice %0 {offsets = [0, 0, 0, 0], sizes = [1, 4, 16, 1], strides = [1, 1, 1, 1]} : vector<1x4x16x16xf32> to vector<1x4x16x1xf32>
    %c0_10 = arith.constant 0 : index
    %c0_11 = arith.constant 0 : index
    %c2_12 = arith.constant 2 : index
    %c1 = arith.constant 1 : index
    %5 = vector.load %arg3[%c0_10, %c0_11, %c2_12, %c1] : memref<1x4x20x20xf32, #tpu.memory_space<vmem>>, vector<1x4x16x1xf32>
    tpu.vector_store %arg3[%c0_10, %c0_11, %c2_12, %c1], %4 {strides = array<i32>} : memref<1x4x20x20xf32, #tpu.memory_space<vmem>>, vector<1x4x16x1xf32>,
    %6 = vector.extract_strided_slice %0 {offsets = [0, 0, 0, 15], sizes = [1, 4, 16, 1], strides = [1, 1, 1, 1]} : vector<1x4x16x16xf32> to vector<1x4x16x1xf32>
    %c0_13 = arith.constant 0 : index
    %c0_14 = arith.constant 0 : index
    %c2_15 = arith.constant 2 : index
    %c18 = arith.constant 18 : index
    %7 = vector.load %arg3[%c0_13, %c0_14, %c2_15, %c18] : memref<1x4x20x20xf32, #tpu.memory_space<vmem>>, vector<1x4x16x1xf32>
    tpu.vector_store %arg3[%c0_13, %c0_14, %c2_15, %c18], %6 {strides = array<i32>} : memref<1x4x20x20xf32, #tpu.memory_space<vmem>>, vector<1x4x16x1xf32>,
    %8 = vector.extract_strided_slice %0 {offsets = [0, 0, 0, 14], sizes = [1, 4, 16, 1], strides = [1, 1, 1, 1]} : vector<1x4x16x16xf32> to vector<1x4x16x1xf32>
    %c0_16 = arith.constant 0 : index
    %c0_17 = arith.constant 0 : index
    %c2_18 = arith.constant 2 : index
    %c19 = arith.constant 19 : index
    %9 = vector.load %arg3[%c0_16, %c0_17, %c2_18, %c19] : memref<1x4x20x20xf32, #tpu.memory_space<vmem>>, vector<1x4x16x1xf32>
    tpu.vector_store %arg3[%c0_16, %c0_17, %c2_18, %c19], %8 {strides = array<i32>} : memref<1x4x20x20xf32, #tpu.memory_space<vmem>>, vector<1x4x16x1xf32>,
    %c0_19 = arith.constant 0 : index
    %c0_20 = arith.constant 0 : index
    %c3 = arith.constant 3 : index
    %c0_21 = arith.constant 0 : index
    %10 = vector.load %arg3[%c0_19, %c0_20, %c3, %c0_21] : memref<1x4x20x20xf32, #tpu.memory_space<vmem>>, vector<1x4x1x20xf32>
    %c0_22 = arith.constant 0 : index
    %c0_23 = arith.constant 0 : index
    %c0_24 = arith.constant 0 : index
    %c0_25 = arith.constant 0 : index
    %11 = vector.load %arg3[%c0_22, %c0_23, %c0_24, %c0_25] : memref<1x4x20x20xf32, #tpu.memory_space<vmem>>, vector<1x4x1x20xf32>
    tpu.vector_store %arg3[%c0_22, %c0_23, %c0_24, %c0_25], %10 {strides = array<i32>} : memref<1x4x20x20xf32, #tpu.memory_space<vmem>>, vector<1x4x1x20xf32>,
    %c0_26 = arith.constant 0 : index
    %c0_27 = arith.constant 0 : index
    %c2_28 = arith.constant 2 : index
    %c0_29 = arith.constant 0 : index
    %12 = vector.load %arg3[%c0_26, %c0_27, %c2_28, %c0_29] : memref<1x4x20x20xf32, #tpu.memory_space<vmem>>, vector<1x4x1x20xf32>
    %c0_30 = arith.constant 0 : index
    %c0_31 = arith.constant 0 : index
    %c1_32 = arith.constant 1 : index
    %c0_33 = arith.constant 0 : index
    %13 = vector.load %arg3[%c0_30, %c0_31, %c1_32, %c0_33] : memref<1x4x20x20xf32, #tpu.memory_space<vmem>>, vector<1x4x1x20xf32>
    tpu.vector_store %arg3[%c0_30, %c0_31, %c1_32, %c0_33], %12 {strides = array<i32>} : memref<1x4x20x20xf32, #tpu.memory_space<vmem>>, vector<1x4x1x20xf32>,
    %c0_34 = arith.constant 0 : index
    %c0_35 = arith.constant 0 : index
    %c17 = arith.constant 17 : index
    %c0_36 = arith.constant 0 : index
    %14 = vector.load %arg3[%c0_34, %c0_35, %c17, %c0_36] : memref<1x4x20x20xf32, #tpu.memory_space<vmem>>, vector<1x4x1x20xf32>
    %c0_37 = arith.constant 0 : index
    %c0_38 = arith.constant 0 : index
    %c18_39 = arith.constant 18 : index
    %c0_40 = arith.constant 0 : index
    %15 = vector.load %arg3[%c0_37, %c0_38, %c18_39, %c0_40] : memref<1x4x20x20xf32, #tpu.memory_space<vmem>>, vector<1x4x1x20xf32>
    tpu.vector_store %arg3[%c0_37, %c0_38, %c18_39, %c0_40], %14 {strides = array<i32>} : memref<1x4x20x20xf32, #tpu.memory_space<vmem>>, vector<1x4x1x20xf32>,
    %c0_41 = arith.constant 0 : index
    %c0_42 = arith.constant 0 : index
    %c16 = arith.constant 16 : index
    %c0_43 = arith.constant 0 : index
    %16 = vector.load %arg3[%c0_41, %c0_42, %c16, %c0_43] : memref<1x4x20x20xf32, #tpu.memory_space<vmem>>, vector<1x4x1x20xf32>
    %c0_44 = arith.constant 0 : index
    %c0_45 = arith.constant 0 : index
    %c19_46 = arith.constant 19 : index
    %c0_47 = arith.constant 0 : index
    %17 = vector.load %arg3[%c0_44, %c0_45, %c19_46, %c0_47] : memref<1x4x20x20xf32, #tpu.memory_space<vmem>>, vector<1x4x1x20xf32>
    tpu.vector_store %arg3[%c0_44, %c0_45, %c19_46, %c0_47], %16 {strides = array<i32>} : memref<1x4x20x20xf32, #tpu.memory_space<vmem>>, vector<1x4x1x20xf32>,
    return
  }
  func.func @transform_0(%arg0: i32, %arg1: i32) -> (i32, i32, i32, i32) {
    %c0_i32 = arith.constant 0 : i32
    %c0_i32_0 = arith.constant 0 : i32
    %c0_i32_1 = arith.constant 0 : i32
    return %arg0, %arg1, %c0_i32, %c0_i32_0 : i32, i32, i32, i32
  }
  func.func @transform_1(%arg0: i32, %arg1: i32) -> (i32, i32, i32, i32) {
    %c0_i32 = arith.constant 0 : i32
    %c0_i32_0 = arith.constant 0 : i32
    %c0_i32_1 = arith.constant 0 : i32
    return %arg0, %arg1, %c0_i32, %c0_i32_0 : i32, i32, i32, i32
  }
}

</mosaic_0001>

<bundles_post_ra>
// kernel: tpu_custom_call.1
= control target key start
LH: loop header
LB: loop body
LE: loop exit
PB: predicated region body
PF: predicated region fallthrough
CT: control target
= control target key end

     0   :  { %6 = vsyncpa [#allocation3], 0  ;;  %s913_s0 = inlined_call_operand.hbm [shape: f32[2,4,16,16], index: 0, kind: input, shape index: {}]   ;;  %s914_s1 = inlined_call_operand.vmem [shape: f32[2,4,20,20], index: 1, kind: output, shape index: {}]  }
   0x1   :  { %8 = vsyncpa [#allocation3 + $0x1], 0  ;;  %s659_s6 = smov 0   ;;  %s661_s7 = smov 0  }
   0x2   :  { %s663_s8 = smov 0   ;;  %s665_s9 = smov 0  }
   0x3   :  { %s667_s10 = smov 0   ;;  %s669_s11 = smov 0  }
   0x4 LB: > { %s483_s12 = sadd.s32 4294967295, %s639_s11   ;;  %s26_s13 = sadd.s32 1, %s635_s10  ;;  %s639_s11 = sphi %s669_s11, %s14_s11   ;;  %s635_s10 = sphi %s667_s10, %s922_s10   ;;  %s631_s9 = sphi %s665_s9, %s921_s9   ;;  %s627_s8 = sphi %s663_s8, %s920_s8   ;;  %s623_s7 = sphi %s661_s7, %s919_s7   ;;  %s619_s6 = sphi %s659_s6, %s918_s6  }
   0x5   : > { %p28_p0 = scmp.ge.s32.totalorder %s26_s13, 2  ;;  %s35_s14 = sadd.s32 1, %s627_s8 }
   0x6   : > { %p42_p1 = scmp.ne.s32.totalorder %s627_s8, %s623_s7  ;;  %p43_p2 = scmp.eq.s32.totalorder %s639_s11, 0 }
   0x7   : > { %s924_s13 = smov (%p28_p0, %s26_s13), 0  ;;  %p48_p4 = scmp.ne.s32.totalorder %s623_s7, %s619_s6 }
   0x8   : > { %p695_p3 = por %p43_p2, %p42_p1  ;;  %s30_s16 = ssub.s32 %s635_s10, %s924_s13 }
   0x9   : > { %p49_p5 = scmp.eq.s32.totalorder %s483_s12, 0  ;;  %p33_p6 = scmp.eq.s32.totalorder %s30_s16, 0 }
   0xa   : > { %p503_p8 = scmp.lt.s32.totalorder %s639_s11, 2  ;;  %s100_s19 = sand.u32 1, %s627_s8  }
   0xb   : > { %p702_p7 = por %p49_p5, %p48_p4  ;;  %s495_s20 = sshll.u32 %s635_s10, 10 }
   0xc   : > { %s708_s18 = scalar_select %p33_p6, %s627_s8, %s35_s14  }
   0xd   : > { %s487_s21 = sshll.u32 %s100_s19, 6  ;;  %s715_s24 = scalar_lea.hbm %s913_s0, %s495_s20 }
   0xe   : > { %s104_s25 = scalar_lea.vmem [#allocation2], %s487_s21  ;;  %p719_p9 = pnand %p503_p8, %p695_p3 }
   0xf   : > { %s114_s26 = sshll.u32 %s104_s25, 4  ;;  %s725_s28 = scalar_lea.sflag [#allocation3], %s100_s19  ;;  %s723_s26 = int_to_ptr.vmem [resolvable:$true] %s114_s26 }
  0x10   : > { %s559_s29 = scalar_lea.hbm %s715_s24, 1024  ;;  %p561_p11 = pneg %p719_p9 }
  0x11   : > { %p560_p10 = scmp.ne.s32.totalorder %s715_s24, %s559_s29  ;;  %s564_s3 = scalar_lea.hbm %s913_s0, 2048 }
  0x12   : > { %p565_p0 = scmp.lt.u32.totalorder %s715_s24, %s913_s0  ;;  %p566_p1 = scmp.lt.u32.totalorder %s564_s3, %s559_s29 }
  0x13   : > { %p562_p12 = pnand %p561_p11, %p560_p10  ;;  %p568_p3 = scmp.lt.u32.totalorder %s559_s29, %s715_s24 }
  0x14   : > { %p567_p2 = por %p566_p1, %p565_p0 }
  0x15   : > { %p563_p13 = pneg %p562_p12 }
  0x16   : > { %p569_p4 = por %p568_p3, %p567_p2 }
  0x18   : > { %p570_p5 = pnand %p569_p4, %p563_p13 }
  0x1a   : > { %573 = shalt.err (!%p570_p5)
}
  0x1b   : > { %s574_s6 = scalar_lea.vmem %s723_s26, 1024  ;;  %s641_s12 = smov [#allocation2]  }
  0x1c   : > { %p575_p6 = scmp.ne.s32.totalorder %s723_s26, %s574_s6  ;;  %s579_s14 = sshll.u32 %s641_s12, 4  ;;  %s580_s14 = int_to_ptr.vmem [resolvable:$false] %s579_s14 }
  0x1d   : > { %s581_s15 = scalar_lea.vmem %s580_s14, 2048  ;;  %p582_p12 = scmp.lt.s32.totalorder %s723_s26, %s580_s14 }
  0x1e   : > { %p577_p8 = pnand %p575_p6, %p561_p11  ;;  %p583_p0 = scmp.lt.s32.totalorder %s581_s15, %s574_s6 }
  0x20   : > { %p578_p10 = pneg %p577_p8  ;;  %p584_p1 = por %p583_p0, %p582_p12 }
  0x22   : > { %p585_p2 = pnand %p584_p1, %p578_p10 }
  0x24   : > { %588 = shalt.err (!%p585_p2)
}
  0x25   : > { %s642_s16 = smov 128   ;;  %s643_s19 = smov 8  }
  0x26   : > { %502 = dma.hbm_to_vmem [thread:$0]  (!%p719_p9), %s715_s24, 1024, %s723_s26, %s725_s28, %s642_s16, %s642_s16, %s643_s19  }
  0x27   : > { %p490_p11 = scmp.ge.s32.totalorder %s639_s11, 1  ;;  %p122_p13 = scmp.lt.s32.totalorder %s639_s11, 3 }
  0x29   : > { %p123_p3 = pnand %p490_p11, %p122_p13 }
  0x2a   : > { %s128_s20 = sand.u32 (!%p123_p3), 1, %s623_s7  }
  0x2b   : > { %126 = sbr.rel (%p123_p3) target bundleno = 255 (0xff), region = 24  ;;  %s491_s21 = sshll.u32 (!%p123_p3), %s128_s20, 6 }
  0x2c   : > { %s129_s22 = scalar_lea.sflag (!%p123_p3), [#allocation3], %s128_s20  ;;  %s132_s23 = scalar_lea.vmem (!%p123_p3), [#allocation2], %s491_s21 }
  0x32   : > { %614 = dma.done.wait (%p702_p7), %s129_s22, 1024  }
  0x33   : > { %616 = vsyncadd (%p702_p7), %s129_s22, 4294966272  ;;  %v170_v0 = vld [vmem:[%s132_s23 + $0x10] sm:$0xff]  ;;  %v168_v1 = vld [vmem:[%s132_s23] sm:$0xff]  ;;  %s644_s25 = smov 2   ;;  %s645_s24 = smov 127   ;;  %vm208_vm0 = vcmask 146448  }
  0x34   : > { %188 = vrot.lane.b32.xlu1 %v170_v0, %s644_s25  ;;  %184 = vrot.lane.b32.xlu0 %v168_v1, %s644_s25  ;;  %v171_v2 = vld [vmem:[%s132_s23 + $0x18] sm:$0xff]  ;;  %v169_v3 = vld [vmem:[%s132_s23 + $0x8] sm:$0xff]  ;;  %s646_s17 = smov 1   ;;  %s647_s26 = smov 3   ;;  %vm241_vm1 = vcmask 7168   ;;  %vm274_vm2 = vcmask 15368  }
  0x35   : > { %v173_v4 = vld [vmem:[%s132_s23 + $0x28] sm:$0xff]  ;;  %v172_v5 = vld [vmem:[%s132_s23 + $0x20] sm:$0xff]  ;;  %v175_v6 = vld [vmem:[%s132_s23 + $0x38] sm:$0xff]  ;;  %s648_s27 = smov 5   ;;  %p158_p7 = scmp.lt.s32.totalorder %s631_s9, 1  ;;  %vm307_vm3 = vcmask 154768  }
  0x36   : > { %v174_v7 = vld [vmem:[%s132_s23 + $0x30] sm:$0xff]  ;;  %vm340_vm4 = vcmask 162968   ;;  %vm353_vm5 = vcmask 155648  }
  0x37   : > { %s926_s9 = smov (!%p158_p7, %s631_s9), 1 }
  0x38   : > { %190 = vrot.lane.b32.xlu1 %v171_v2, %s644_s25  ;;  %186 = vrot.lane.b32.xlu0 %v169_v3, %s644_s25  ;;  %s496_s28 = smul.u32 96, %s926_s9 }
  0x3a   : > { %s765_s2 = scalar_lea.vmem %s914_s1, %s496_s28 }
  0x3c   : > { %194 = vrot.lane.b32.xlu1 %v173_v4, %s644_s25  ;;  %192 = vrot.lane.b32.xlu0 %v172_v5, %s644_s25 }
  0x40   : > { %198 = vrot.lane.b32.xlu1 %v175_v6, %s644_s25  ;;  %196 = vrot.lane.b32.xlu0 %v174_v7, %s644_s25 }
  0x44   : > { %219 = vrot.lane.b32.xlu1 %v169_v3, %s645_s24  ;;  %217 = vrot.lane.b32.xlu0 %v168_v1, %s645_s24 }
  0x48   : > { %223 = vrot.lane.b32.xlu1 %v171_v2, %s645_s24  ;;  %221 = vrot.lane.b32.xlu0 %v170_v0, %s645_s24 }
  0x4c   : > { %227 = vrot.lane.b32.xlu1 %v173_v4, %s645_s24  ;;  %225 = vrot.lane.b32.xlu0 %v172_v5, %s645_s24 }
  0x50   : > { %231 = vrot.lane.b32.xlu1 %v175_v6, %s645_s24  ;;  %229 = vrot.lane.b32.xlu0 %v174_v7, %s645_s24 }
  0x54   : > { %252 = vrot.lane.b32.xlu1 %v169_v3, %s646_s17  ;;  %250 = vrot.lane.b32.xlu0 %v168_v1, %s646_s17 }
  0x58   : > { %256 = vrot.lane.b32.xlu1 %v171_v2, %s646_s17  ;;  %254 = vrot.lane.b32.xlu0 %v170_v0, %s646_s17 }
  0x5c   : > { %260 = vrot.lane.b32.xlu1 %v173_v4, %s646_s17  ;;  %258 = vrot.lane.b32.xlu0 %v172_v5, %s646_s17 }
  0x60   : > { %264 = vrot.lane.b32.xlu1 %v175_v6, %s646_s17  ;;  %262 = vrot.lane.b32.xlu0 %v174_v7, %s646_s17 }
  0x64   : > { %285 = vrot.lane.b32.xlu1 %v169_v3, %s647_s26  ;;  %283 = vrot.lane.b32.xlu0 %v168_v1, %s647_s26 }
  0x68   : > { %289 = vrot.lane.b32.xlu1 %v171_v2, %s647_s26  ;;  %287 = vrot.lane.b32.xlu0 %v170_v0, %s647_s26 }
  0x6c   : > { %293 = vrot.lane.b32.xlu1 %v173_v4, %s647_s26  ;;  %291 = vrot.lane.b32.xlu0 %v172_v5, %s647_s26 }
  0x70   : > { %297 = vrot.lane.b32.xlu1 %v175_v6, %s647_s26  ;;  %295 = vrot.lane.b32.xlu0 %v174_v7, %s647_s26 }
  0x74   : > { %318 = vrot.lane.b32.xlu1 %v169_v3, %s648_s27  ;;  %316 = vrot.lane.b32.xlu0 %v168_v1, %s648_s27 }
  0x78   : > { %322 = vrot.lane.b32.xlu1 %v171_v2, %s648_s27  ;;  %320 = vrot.lane.b32.xlu0 %v170_v0, %s648_s27 }
  0x7c   : > { %326 = vrot.lane.b32.xlu1 %v173_v4, %s648_s27  ;;  %324 = vrot.lane.b32.xlu0 %v172_v5, %s648_s27 }
  0x80   : > { %330 = vrot.lane.b32.xlu1 %v175_v6, %s648_s27  ;;  %328 = vrot.lane.b32.xlu0 %v174_v7, %s648_s27 }
  0xa6   : > { %v189_v8 = vpop.permute.xlu1 %188  ;;  %v185_v9 = vpop.permute.xlu0 %184 }
  0xa7   : > { %211 = vst.msk [vmem:[%s765_s2 + $0x1a] sm:$0xff] %vm208_vm0, %v189_v8  ;;  %209 = vst.msk [vmem:[%s765_s2 + $0x2] sm:$0xff] %vm208_vm0, %v185_v9 }
  0xaa   : > { %v191_v10 = vpop.permute.xlu1 %190  ;;  %v187_v11 = vpop.permute.xlu0 %186 }
  0xab   : > { %212 = vst.msk [vmem:[%s765_s2 + $0x22] sm:$0xff] %vm208_vm0, %v191_v10  ;;  %210 = vst.msk [vmem:[%s765_s2 + $0xa] sm:$0xff] %vm208_vm0, %v187_v11 }
  0xae   : > { %v195_v12 = vpop.permute.xlu1 %194  ;;  %v193_v13 = vpop.permute.xlu0 %192 }
  0xaf   : > { %214 = vst.msk [vmem:[%s765_s2 + $0x3a] sm:$0xff] %vm208_vm0, %v195_v12  ;;  %213 = vst.msk [vmem:[%s765_s2 + $0x32] sm:$0xff] %vm208_vm0, %v193_v13 }
  0xb2   : > { %v199_v14 = vpop.permute.xlu1 %198  ;;  %v197_v15 = vpop.permute.xlu0 %196 }
  0xb3   : > { %216 = vst.msk [vmem:[%s765_s2 + $0x52] sm:$0xff] %vm208_vm0, %v199_v14  ;;  %215 = vst.msk [vmem:[%s765_s2 + $0x4a] sm:$0xff] %vm208_vm0, %v197_v15 }
  0xb6   : > { %v220_v16 = vpop.permute.xlu1 %219  ;;  %v218_v17 = vpop.permute.xlu0 %217 }
  0xb7   : > { %243 = vst.msk [vmem:[%s765_s2 + $0xa] sm:$0xff] %vm241_vm1, %v220_v16  ;;  %242 = vst.msk [vmem:[%s765_s2 + $0x2] sm:$0xff] %vm241_vm1, %v218_v17 }
  0xba   : > { %v224_v18 = vpop.permute.xlu1 %223  ;;  %v222_v19 = vpop.permute.xlu0 %221 }
  0xbb   : > { %245 = vst.msk [vmem:[%s765_s2 + $0x22] sm:$0xff] %vm241_vm1, %v224_v18  ;;  %244 = vst.msk [vmem:[%s765_s2 + $0x1a] sm:$0xff] %vm241_vm1, %v222_v19 }
  0xbe   : > { %v228_v20 = vpop.permute.xlu1 %227  ;;  %v226_v21 = vpop.permute.xlu0 %225 }
  0xbf   : > { %247 = vst.msk [vmem:[%s765_s2 + $0x3a] sm:$0xff] %vm241_vm1, %v228_v20  ;;  %246 = vst.msk [vmem:[%s765_s2 + $0x32] sm:$0xff] %vm241_vm1, %v226_v21 }
  0xc2   : > { %v232_v22 = vpop.permute.xlu1 %231  ;;  %v230_v23 = vpop.permute.xlu0 %229 }
  0xc3   : > { %249 = vst.msk [vmem:[%s765_s2 + $0x52] sm:$0xff] %vm241_vm1, %v232_v22  ;;  %248 = vst.msk [vmem:[%s765_s2 + $0x4a] sm:$0xff] %vm241_vm1, %v230_v23 }
  0xc6   : > { %v253_v24 = vpop.permute.xlu1 %252  ;;  %v251_v25 = vpop.permute.xlu0 %250 }
  0xc7   : > { %276 = vst.msk [vmem:[%s765_s2 + $0xa] sm:$0xff] %vm274_vm2, %v253_v24  ;;  %275 = vst.msk [vmem:[%s765_s2 + $0x2] sm:$0xff] %vm274_vm2, %v251_v25 }
  0xca   : > { %v257_v26 = vpop.permute.xlu1 %256  ;;  %v255_v27 = vpop.permute.xlu0 %254 }
  0xcb   : > { %278 = vst.msk [vmem:[%s765_s2 + $0x22] sm:$0xff] %vm274_vm2, %v257_v26  ;;  %277 = vst.msk [vmem:[%s765_s2 + $0x1a] sm:$0xff] %vm274_vm2, %v255_v27 }
  0xce   : > { %v261_v28 = vpop.permute.xlu1 %260  ;;  %v259_v29 = vpop.permute.xlu0 %258 }
  0xcf   : > { %280 = vst.msk [vmem:[%s765_s2 + $0x3a] sm:$0xff] %vm274_vm2, %v261_v28  ;;  %279 = vst.msk [vmem:[%s765_s2 + $0x32] sm:$0xff] %vm274_vm2, %v259_v29 }
  0xd2   : > { %v265_v30 = vpop.permute.xlu1 %264  ;;  %v263_v31 = vpop.permute.xlu0 %262 }
  0xd3   : > { %282 = vst.msk [vmem:[%s765_s2 + $0x52] sm:$0xff] %vm274_vm2, %v265_v30  ;;  %281 = vst.msk [vmem:[%s765_s2 + $0x4a] sm:$0xff] %vm274_vm2, %v263_v31 }
  0xd6   : > { %v286_v32 = vpop.permute.xlu1 %285  ;;  %v284_v33 = vpop.permute.xlu0 %283 }
  0xd7   : > { %309 = vst.msk [vmem:[%s765_s2 + $0xa] sm:$0xff] %vm307_vm3, %v286_v32  ;;  %308 = vst.msk [vmem:[%s765_s2 + $0x2] sm:$0xff] %vm307_vm3, %v284_v33 }
  0xda   : > { %v290_v34 = vpop.permute.xlu1 %289  ;;  %v288_v35 = vpop.permute.xlu0 %287 }
  0xdb   : > { %311 = vst.msk [vmem:[%s765_s2 + $0x22] sm:$0xff] %vm307_vm3, %v290_v34  ;;  %310 = vst.msk [vmem:[%s765_s2 + $0x1a] sm:$0xff] %vm307_vm3, %v288_v35 }
  0xde   : > { %v294_v36 = vpop.permute.xlu1 %293  ;;  %v292_v37 = vpop.permute.xlu0 %291 }
  0xdf   : > { %313 = vst.msk [vmem:[%s765_s2 + $0x3a] sm:$0xff] %vm307_vm3, %v294_v36  ;;  %312 = vst.msk [vmem:[%s765_s2 + $0x32] sm:$0xff] %vm307_vm3, %v292_v37 }
  0xe2   : > { %v298_v38 = vpop.permute.xlu1 %297  ;;  %v296_v39 = vpop.permute.xlu0 %295 }
  0xe3   : > { %315 = vst.msk [vmem:[%s765_s2 + $0x52] sm:$0xff] %vm307_vm3, %v298_v38  ;;  %314 = vst.msk [vmem:[%s765_s2 + $0x4a] sm:$0xff] %vm307_vm3, %v296_v39 }
  0xe6   : > { %v319_v40 = vpop.permute.xlu1 %318  ;;  %v317_v41 = vpop.permute.xlu0 %316 }
  0xe7   : > { %342 = vst.msk [vmem:[%s765_s2 + $0xa] sm:$0xff] %vm340_vm4, %v319_v40  ;;  %341 = vst.msk [vmem:[%s765_s2 + $0x2] sm:$0xff] %vm340_vm4, %v317_v41 }
  0xea   : > { %v323_v42 = vpop.permute.xlu1 %322  ;;  %v321_v43 = vpop.permute.xlu0 %320 }
  0xeb   : > { %344 = vst.msk [vmem:[%s765_s2 + $0x22] sm:$0xff] %vm340_vm4, %v323_v42  ;;  %343 = vst.msk [vmem:[%s765_s2 + $0x1a] sm:$0xff] %vm340_vm4, %v321_v43 }
  0xee   : > { %v366_v44 = vld [vmem:[%s765_s2 + $0x11] sm:$0x1]  ;;  %v374_v45 = vld [vmem:[%s765_s2 + $0x10] sm:$0x1]  ;;  %v349_v46 = vld [vmem:[%s765_s2 + $0x3] sm:$0x1]  ;;  %v327_v47 = vpop.permute.xlu1 %326  ;;  %v325_v48 = vpop.permute.xlu0 %324 }
  0xef   : > { %370 = vst.msk [vmem:[%s765_s2 + $0x12] sm:$0x1] %vm353_vm5, %v366_v44  ;;  %378 = vst.msk [vmem:[%s765_s2 + $0x13] sm:$0x1] %vm353_vm5, %v374_v45  ;;  %v358_v49 = vld [vmem:[%s765_s2 + $0x2] sm:$0x1] }
  0xf0   : > { %354 = vst.msk [vmem:[%s765_s2] sm:$0x1] %vm353_vm5, %v349_v46  ;;  %362 = vst.msk [vmem:[%s765_s2 + $0x1] sm:$0x1] %vm353_vm5, %v358_v49 }
  0xf1   : > { %346 = vst.msk [vmem:[%s765_s2 + $0x3a] sm:$0xff] %vm340_vm4, %v327_v47  ;;  %345 = vst.msk [vmem:[%s765_s2 + $0x32] sm:$0xff] %vm340_vm4, %v325_v48 }
  0xf2   : > { %v367_v50 = vld [vmem:[%s765_s2 + $0x29] sm:$0x1]  ;;  %v375_v51 = vld [vmem:[%s765_s2 + $0x28] sm:$0x1]  ;;  %v350_v52 = vld [vmem:[%s765_s2 + $0x1b] sm:$0x1]  ;;  %v331_v53 = vpop.permute.xlu1 %330  ;;  %v329_v54 = vpop.permute.xlu0 %328 }
  0xf3   : > { %371 = vst.msk [vmem:[%s765_s2 + $0x2a] sm:$0x1] %vm353_vm5, %v367_v50  ;;  %379 = vst.msk [vmem:[%s765_s2 + $0x2b] sm:$0x1] %vm353_vm5, %v375_v51  ;;  %v359_v55 = vld [vmem:[%s765_s2 + $0x1a] sm:$0x1] }
  0xf4   : > { %355 = vst.msk [vmem:[%s765_s2 + $0x18] sm:$0x1] %vm353_vm5, %v350_v52  ;;  %363 = vst.msk [vmem:[%s765_s2 + $0x19] sm:$0x1] %vm353_vm5, %v359_v55 }
  0xf5   : > { %348 = vst.msk [vmem:[%s765_s2 + $0x52] sm:$0xff] %vm340_vm4, %v331_v53  ;;  %347 = vst.msk [vmem:[%s765_s2 + $0x4a] sm:$0xff] %vm340_vm4, %v329_v54 }
  0xf8   : > { %v368_v56 = vld [vmem:[%s765_s2 + $0x41] sm:$0x1]  ;;  %v376_v57 = vld [vmem:[%s765_s2 + $0x40] sm:$0x1]  ;;  %v351_v58 = vld [vmem:[%s765_s2 + $0x33] sm:$0x1] }
  0xf9   : > { %372 = vst.msk [vmem:[%s765_s2 + $0x42] sm:$0x1] %vm353_vm5, %v368_v56  ;;  %380 = vst.msk [vmem:[%s765_s2 + $0x43] sm:$0x1] %vm353_vm5, %v376_v57  ;;  %v360_v59 = vld [vmem:[%s765_s2 + $0x32] sm:$0x1] }
  0xfa   : > { %356 = vst.msk [vmem:[%s765_s2 + $0x30] sm:$0x1] %vm353_vm5, %v351_v58  ;;  %364 = vst.msk [vmem:[%s765_s2 + $0x31] sm:$0x1] %vm353_vm5, %v360_v59 }
  0xfc   : > { %v369_v60 = vld [vmem:[%s765_s2 + $0x59] sm:$0x1]  ;;  %v377_v61 = vld [vmem:[%s765_s2 + $0x58] sm:$0x1]  ;;  %v352_v62 = vld [vmem:[%s765_s2 + $0x4b] sm:$0x1] }
  0xfd   : > { %373 = vst.msk [vmem:[%s765_s2 + $0x5a] sm:$0x1] %vm353_vm5, %v369_v60  ;;  %381 = vst.msk [vmem:[%s765_s2 + $0x5b] sm:$0x1] %vm353_vm5, %v377_v61  ;;  %v361_v63 = vld [vmem:[%s765_s2 + $0x4a] sm:$0x1] }
  0xfe   : > { %357 = vst.msk [vmem:[%s765_s2 + $0x48] sm:$0x1] %vm353_vm5, %v352_v62  ;;  %365 = vst.msk [vmem:[%s765_s2 + $0x49] sm:$0x1] %vm353_vm5, %v361_v63 }
  0xff PF: > { %s14_s11 = sadd.s32 1, %s639_s11   ;;  %s918_s6 = smov %s623_s7 }
 0x100   : > { %p11_p9 = scmp.ge.s32.totalorder %s14_s11, 4   ;;  %s919_s7 = smov %s627_s8 }
 0x101   : > { %s920_s8 = smov %s708_s18  ;;  %s921_s9 = smov %s635_s10 }
 0x102   : > { %s922_s10 = smov %s924_s13  ;;  %13 = sbr.rel (!%p11_p9) target bundleno = 4 (0x4), region = 64 }
 0x109   :  { %414 = vsyncpa [#allocation3], 1 }
 0x10a   :  { %416 = vsyncpa [#allocation3 + $0x1], 1 }

</bundles_post_ra>
